<compile_context>
chip_gen: v5e
topology: v5e:2x2
jax: 0.10.0
libtpu: 0.0.40
codegen_flags: <defaults>
</compile_context>

<pallas_src>
import jax
import jax.numpy as jnp
from jax.experimental import pallas as pl
from jax.experimental.pallas import tpu as pltpu


def _round_up(x, m):
    return ((x + m - 1) // m) * m


def _pick_tile(n):
    """128-aligned square tile for A: as large as 1024, but prefer >=2 row
    tiles so the 'parallel' row axis can be sharded across v7x's 2 TCs."""
    n128 = _round_up(max(int(n), 1), 128)
    for tile in (1024, 512, 256, 128):
        if tile <= n128 and (n128 // tile >= 2 or tile == 128):
            return tile
    return 128


# ---------------------------------------------------------------------------
# Kernel 1: H = x @ W + b   (computed once, stored as bf16)
# ---------------------------------------------------------------------------
def _linear_kernel(x_ref, w_ref, b_ref, h_ref):
    h = jnp.dot(x_ref[...], w_ref[...], preferred_element_type=jnp.float32)
    h_ref[...] = (h + b_ref[...]).astype(h_ref.dtype)


def _linear_bf16(x, w, b, n_pad, d_out_pad, tile):
    n, dim_in = x.shape
    dim_out = w.shape[1]
    x_p = jnp.pad(x, ((0, n_pad - n), (0, 0))).astype(jnp.bfloat16)
    w_p = jnp.pad(w, ((0, 0), (0, d_out_pad - dim_out))).astype(jnp.bfloat16)
    b_p = jnp.pad(b.reshape(1, dim_out).astype(jnp.float32),
                  ((0, 0), (0, d_out_pad - dim_out)))

    return pl.pallas_call(
        _linear_kernel,
        out_shape=jax.ShapeDtypeStruct((n_pad, d_out_pad), jnp.bfloat16),
        grid_spec=pltpu.PrefetchScalarGridSpec(
            num_scalar_prefetch=0,
            grid=(n_pad // tile,),
            in_specs=[
                pl.BlockSpec((tile, dim_in), lambda i: (i, 0)),        # x (bf16)
                pl.BlockSpec((dim_in, d_out_pad), lambda i: (0, 0)),   # W (bf16)
                pl.BlockSpec((1, d_out_pad), lambda i: (0, 0)),        # b (f32)
            ],
            out_specs=pl.BlockSpec((tile, d_out_pad), lambda i: (i, 0)),
        ),
        compiler_params=pltpu.CompilerParams(
            dimension_semantics=("parallel",),
        ),
    )(x_p, w_p, b_p)


# ---------------------------------------------------------------------------
# Kernel 2: out = A @ H   (bf16-streamed A, f32 accumulation in o_ref)
# ---------------------------------------------------------------------------
def _aggregate_kernel_resident(a_ref, h_ref, o_ref):
    # h_ref is the full (n_pad, d_out_pad) H, VMEM-resident (constant index map).
    k = pl.program_id(1)

    @pl.when(k == 0)
    def _():
        o_ref[...] = jnp.zeros_like(o_ref)

    tk = a_ref.shape[1]
    start = pl.multiple_of(k * tk, 128)
    o_ref[...] += jnp.dot(a_ref[...], h_ref[pl.ds(start, tk), :],
                          preferred_element_type=jnp.float32)


def _aggregate_kernel_tiled(a_ref, h_ref, o_ref):
    k = pl.program_id(1)

    @pl.when(k == 0)
    def _():
        o_ref[...] = jnp.zeros_like(o_ref)

    o_ref[...] += jnp.dot(a_ref[...], h_ref[...],
                          preferred_element_type=jnp.float32)


def _aggregate(a_p, h, n_pad, d_out_pad, tile):
    grid = (n_pad // tile, n_pad // tile)

    h_bytes = n_pad * d_out_pad * 2
    resident = h_bytes <= (12 << 20)   # keep H fully VMEM-resident when modest

    a_block = tile * tile * 2
    o_block = tile * d_out_pad * 4
    if resident:
        kernel = _aggregate_kernel_resident
        h_spec = pl.BlockSpec((n_pad, d_out_pad), lambda i, k: (0, 0))
        needed = 2 * a_block + 2 * h_bytes + 2 * o_block
    else:
        kernel = _aggregate_kernel_tiled
        h_spec = pl.BlockSpec((tile, d_out_pad), lambda i, k: (k, 0))
        needed = 2 * a_block + 2 * tile * d_out_pad * 2 + 2 * o_block

    # Explicit scoped-VMEM budget from actual block sizes (v5e default ~16MiB
    # is too small for big tiles; cap at 64MiB to stay v7x-safe).
    vmem_limit = int(min(max(2 * needed, 32 << 20), 64 << 20))

    return pl.pallas_call(
        kernel,
        out_shape=jax.ShapeDtypeStruct((n_pad, d_out_pad), jnp.float32),
        grid_spec=pltpu.PrefetchScalarGridSpec(
            num_scalar_prefetch=0,
            grid=grid,
            in_specs=[
                pl.BlockSpec((tile, tile), lambda i, k: (i, k)),   # A (bf16)
                h_spec,                                            # H (bf16)
            ],
            out_specs=pl.BlockSpec((tile, d_out_pad), lambda i, k: (i, 0)),
        ),
        compiler_params=pltpu.CompilerParams(
            dimension_semantics=("parallel", "arbitrary"),
            vmem_limit_bytes=vmem_limit,
        ),
    )(a_p, h)


# ---------------------------------------------------------------------------
# Public API
# ---------------------------------------------------------------------------
def prepare_adjacency(a_matrix, a_dtype=jnp.bfloat16):
    """Cast + zero-pad A once. Cache this across forward calls: A is the
    dominant HBM stream and should not be re-materialized on the hot path."""
    n = a_matrix.shape[0]
    tile = _pick_tile(n)
    n_pad = _round_up(n, tile)
    return jnp.pad(a_matrix.astype(a_dtype), ((0, n_pad - n), (0, n_pad - n)))


def graph_conv(x, w, b, a_prepared):
    """GraphConv forward: A @ (x @ W + b).

    x:          (N, dim_in)  float32
    w:          (dim_in, dim_out) float32  (transpose of torch Linear .weight)
    b:          (dim_out,)   float32
    a_prepared: (N_pad, N_pad) bf16 from prepare_adjacency()
    returns:    (N, dim_out) float32
    """
    n, dim_in = x.shape
    dim_out = w.shape[1]
    tile = _pick_tile(n)
    n_pad = _round_up(n, tile)
    assert a_prepared.shape == (n_pad, n_pad), (
        "a_prepared must come from prepare_adjacency() for this N")
    d_out_pad = _round_up(dim_out, 128)   # lane-dense output stores

    # H = x @ W + b, computed once (hoisted out of the A reduction).
    # Padded A columns are zero, so padded H rows (== b) contribute nothing;
    # padded A rows are zero so padded output rows are zero (sliced off below).
    h = _linear_bf16(x, w, b, n_pad, d_out_pad, tile)
    out_p = _aggregate(a_prepared, h, n_pad, d_out_pad, tile)
    return out_p[:n, :dim_out].astype(x.dtype)


def graph_conv_dense(x, w, b, a_matrix):
    """Convenience wrapper taking the raw (N, N) float32 adjacency."""
    return graph_conv(x, w, b, prepare_adjacency(a_matrix))


if __name__ == "__main__":
    def _check(n, dim_in, dim_out, seed):
        key = jax.random.PRNGKey(seed)
        kx, kw, kb, ka = jax.random.split(key, 4)
        x = jax.random.normal(kx, (n, dim_in), dtype=jnp.float32)
        # torch nn.Linear weight is (dim_out, dim_in); we store its transpose.
        w = jax.random.normal(kw, (dim_in, dim_out), dtype=jnp.float32) * 0.1
        b = jax.random.normal(kb, (dim_out,), dtype=jnp.float32) * 0.1
        a = jax.random.normal(ka, (n, n), dtype=jnp.float32)

        a_prep = prepare_adjacency(a)           # cast + pad once (cacheable)
        out = jax.block_until_ready(graph_conv(x, w, b, a_prep))
        assert out.shape == (n, dim_out)

        # Reference mirroring the kernel's bf16 streaming (f32 accumulate).
        xq = x.astype(jnp.bfloat16).astype(jnp.float32)
        wq = w.astype(jnp.bfloat16).astype(jnp.float32)
        hq = (xq @ wq + b).astype(jnp.bfloat16).astype(jnp.float32)
        aq = a.astype(jnp.bfloat16).astype(jnp.float32)
        ref_q = aq @ hq
        assert jnp.allclose(out, ref_q, atol=1e-1, rtol=2e-2), (
            float(jnp.max(jnp.abs(out - ref_q))))

        # Loose check against the pure-f32 PyTorch-equivalent math.
        ref_f32 = a @ (x @ w + b)
        scale = jnp.maximum(jnp.max(jnp.abs(ref_f32)), 1.0)
        assert float(jnp.max(jnp.abs(out - ref_f32)) / scale) < 5e-2

    # Small shape consistent with the module (N nodes, dim_in -> dim_out).
    _check(8, 32, 16, 0)
    # Multi-tile case (exercises padding + the k reduction; tile = 128).
    _check(300, 48, 20, 1)

    print("KERNEL_OK")
</pallas_src>

<mosaic_0001>
module attributes {stable_mosaic.version = 11 : i64} {
  func.func @_linear_kernel(%arg0: i32, %arg1: memref<128x32xbf16, #tpu.memory_space<vmem>>, %arg2: memref<32x128xbf16, #tpu.memory_space<vmem>>, %arg3: memref<1x128xf32, #tpu.memory_space<vmem>>, %arg4: memref<128x128xbf16, #tpu.memory_space<vmem>>) attributes {dimension_semantics = [#tpu.dimension_semantics<parallel>], iteration_bounds = array<i64: 1>, scalar_prefetch = 0 : i64, scratch_operands = 0 : i64, tpu.core_type = #tpu.core_type<tc>, window_params = [{transform_indices = @transform_0, window_bounds = array<i64: 128, 32>}, {pipeline_mode = #tpu.pipeline_mode<synchronous>, transform_indices = @transform_1, window_bounds = array<i64: 32, 128>}, {pipeline_mode = #tpu.pipeline_mode<synchronous>, transform_indices = @transform_2, window_bounds = array<i64: 1, 128>}, {transform_indices = @transform_3, window_bounds = array<i64: 128, 128>}]} {
    %c0 = arith.constant 0 : index
    %c0_0 = arith.constant 0 : index
    %0 = vector.load %arg1[%c0, %c0_0] : memref<128x32xbf16, #tpu.memory_space<vmem>>, vector<128x32xbf16>
    %c0_1 = arith.constant 0 : index
    %c0_2 = arith.constant 0 : index
    %1 = vector.load %arg2[%c0_1, %c0_2] : memref<32x128xbf16, #tpu.memory_space<vmem>>, vector<32x128xbf16>
    %cst = arith.constant dense<0.000000e+00> : vector<128x128xf32>
    %2 = tpu.matmul %0, %1, %cst {dimension_numbers = #tpu.dot_dimension_numbers<[1], [0], [0], [1], [0, 0, 1, 1], [], []>} : vector<128x32xbf16>, vector<32x128xbf16>, vector<128x128xf32> -> vector<128x128xf32>
    %c0_3 = arith.constant 0 : index
    %c0_4 = arith.constant 0 : index
    %3 = vector.load %arg3[%c0_3, %c0_4] : memref<1x128xf32, #tpu.memory_space<vmem>>, vector<1x128xf32>
    %4 = vector.broadcast %3 : vector<1x128xf32> to vector<128x128xf32>
    %5 = arith.addf %2, %4 : vector<128x128xf32>
    %6 = arith.truncf %5 : vector<128x128xf32> to vector<128x128xbf16>
    %c0_5 = arith.constant 0 : index
    %c0_6 = arith.constant 0 : index
    %7 = vector.load %arg4[%c0_5, %c0_6] : memref<128x128xbf16, #tpu.memory_space<vmem>>, vector<128x128xbf16>
    tpu.vector_store %arg4[%c0_5, %c0_6], %6 {strides = array<i32>} : memref<128x128xbf16, #tpu.memory_space<vmem>>, vector<128x128xbf16>,
    return
  }
  func.func @transform_0(%arg0: i32) -> (i32, i32) {
    %c0_i32 = arith.constant 0 : i32
    %c0_i32_0 = arith.constant 0 : i32
    return %arg0, %c0_i32 : i32, i32
  }
  func.func @transform_1(%arg0: i32) -> (i32, i32) {
    %c0_i32 = arith.constant 0 : i32
    %c0_i32_0 = arith.constant 0 : i32
    %c0_i32_1 = arith.constant 0 : i32
    return %c0_i32, %c0_i32_0 : i32, i32
  }
  func.func @transform_2(%arg0: i32) -> (i32, i32) {
    %c0_i32 = arith.constant 0 : i32
    %c0_i32_0 = arith.constant 0 : i32
    %c0_i32_1 = arith.constant 0 : i32
    return %c0_i32, %c0_i32_0 : i32, i32
  }
  func.func @transform_3(%arg0: i32) -> (i32, i32) {
    %c0_i32 = arith.constant 0 : i32
    %c0_i32_0 = arith.constant 0 : i32
    return %arg0, %c0_i32 : i32, i32
  }
}

</mosaic_0001>

<bundles_post_ra>
// kernel: tpu_custom_call.1
= control target key start
LH: loop header
LB: loop body
LE: loop exit
PB: predicated region body
PF: predicated region fallthrough
CT: control target
= control target key end

     0   :  { %s424_s0 = inlined_call_operand.vmem [shape: bf16[128,32], index: 0, kind: input, shape index: {}]   ;;  %s425_s1 = inlined_call_operand.vmem [shape: bf16[32,128], index: 1, kind: input, shape index: {}]   ;;  %s426_s2 = inlined_call_operand.vmem [shape: f32[1,128], index: 2, kind: input, shape index: {}]   ;;  %s427_s3 = inlined_call_operand.hbm [shape: bf16[128,128], index: 3, kind: output, shape index: {}]  }
   0x1   :  { %v273_v0 = vld [vmem:[%s425_s1 + $0x8] sm:$0xff]  ;;  %v272_v1 = vld [vmem:[%s425_s1] sm:$0xff] }
   0x2   :  { %123 = vmatpush.bf16.msra.mxu0 %v273_v0  ;;  %321 = vmatpush.bf16.msra.mxu1 %v273_v0 }
   0x3   :  { %322 = vmatpush.bf16.msra.mxu2 %v273_v0  ;;  %323 = vmatpush.bf16.msra.mxu3 %v273_v0 }
   0x4   :  { %8 = vsyncpa [#allocation3], 0  ;;  %v264_v2 = vld [vmem:[%s424_s0] sm:$0xff]  ;;  %v266_v3 = vld [vmem:[%s424_s0 + $0x10] sm:$0xff]  ;;  %vm92_vm0 = vcmask 261120   ;;  %s204_s8 = sshll.u32 %s427_s3, 4  ;;  %s205_s8 = int_to_ptr.hbm [resolvable:$true] %s204_s8 }
   0x5   :  { %v268_v4 = vld [vmem:[%s424_s0 + $0x20] sm:$0xff]  ;;  %v270_v5 = vld [vmem:[%s424_s0 + $0x30] sm:$0xff]  ;;  %v265_v6 = vld [vmem:[%s424_s0 + $0x8] sm:$0xff]  ;;  %s358_s9 = smov 64   ;;  %s359_s10 = smov 4  }
   0x6   :  { %124 = vmatpush.bf16.msra.mxu0 %v272_v1  ;;  %324 = vmatpush.bf16.msra.mxu1 %v272_v1  ;;  %v267_v7 = vld [vmem:[%s424_s0 + $0x18] sm:$0xff]  ;;  %v269_v8 = vld [vmem:[%s424_s0 + $0x28] sm:$0xff]  ;;  %v330_v12 = vld [vmem:[%s426_s2] ss:$0 sm:$0xff] }
   0x7   :  { %325 = vmatpush.bf16.msra.mxu2 %v272_v1  ;;  %326 = vmatpush.bf16.msra.mxu3 %v272_v1  ;;  %v271_v9 = vld [vmem:[%s424_s0 + $0x38] sm:$0xff]  ;;  %s357_s0 = smov [#allocation2]  }
   0x8   :  { %s202_s2 = sshll.u32 %s357_s0, 4  ;;  %s203_s2 = int_to_ptr.vmem [resolvable:$true] %s202_s2 }
   0x9   :  { %256 = vmatmul.msk.bf16.vlgmr.msra.gmra.mxu0 %vm92_vm0, %v264_v2  ;;  %258 = vmatmul.msk.bf16.vlgmr.msra.gmra.mxu1 %vm92_vm0, %v266_v3 }
   0xa   :  { %260 = vmatmul.msk.bf16.vlgmr.msra.gmra.mxu2 %vm92_vm0, %v268_v4  ;;  %262 = vmatmul.msk.bf16.vlgmr.msra.gmra.mxu3 %vm92_vm0, %v270_v5 }
  0x19   :  { %257 = vmatmul.msk.bf16.gmra.mxu0 %vm92_vm0, %v265_v6  ;;  %259 = vmatmul.msk.bf16.gmra.mxu1 %vm92_vm0, %v267_v7 }
  0x1a   :  { %261 = vmatmul.msk.bf16.gmra.mxu2 %vm92_vm0, %v269_v8  ;;  %263 = vmatmul.msk.bf16.gmra.mxu3 %vm92_vm0, %v271_v9 }
  0x86   :  { %v126_v10 = vpop.f32.mrf.mxu0  ;;  %v136_v11 = vpop.f32.mrf.mxu1 }
  0x87   :  { %v127_v17 = vadd.f32 %v330_v12, %v126_v10  ;;  %v137_v18 = vadd.f32 %v330_v12, %v136_v11 }
  0x8d   :  { %v146_v13 = vpop.f32.mrf.mxu2  ;;  %v156_v14 = vpop.f32.mrf.mxu3 }
  0x8e   :  { %v128_v15 = vpop.f32.mrf.mxu0  ;;  %v138_v16 = vpop.f32.mrf.mxu1  ;;  %v147_v25 = vadd.f32 %v330_v12, %v146_v13  ;;  %v157_v26 = vadd.f32 %v330_v12, %v156_v14 }
  0x8f   :  { %v129_v19 = vadd.f32 %v330_v12, %v128_v15  ;;  %v139_v20 = vadd.f32 %v330_v12, %v138_v16 }
  0x91   :  { %v277_v21 = vpack.c.bf16 %v129_v19, %v127_v17  ;;  %v287_v22 = vpack.c.bf16 %v139_v20, %v137_v18 }
  0x93   :  { %278 = vst [vmem:[#allocation2] sm:$0xff] %v277_v21  }
  0x94   :  { %315 = vst [vmem:[#allocation2 + $0x10] sm:$0xff] %v287_v22  }
  0x95   :  { %v148_v23 = vpop.f32.mrf.mxu2  ;;  %v158_v24 = vpop.f32.mrf.mxu3 }
  0x96   :  { %v149_v27 = vadd.f32 %v330_v12, %v148_v23  ;;  %v159_v28 = vadd.f32 %v330_v12, %v158_v24  ;;  %v131_v29 = vpop.f32.mrf.mxu0  ;;  %v141_v30 = vpop.f32.mrf.mxu1 }
  0x97   :  { %v132_v37 = vadd.f32 %v330_v12, %v131_v29  ;;  %v142_v38 = vadd.f32 %v330_v12, %v141_v30 }
  0x98   :  { %v297_v31 = vpack.c.bf16 %v149_v27, %v147_v25  ;;  %v307_v32 = vpack.c.bf16 %v159_v28, %v157_v26 }
  0x9a   :  { %317 = vst [vmem:[#allocation2 + $0x20] sm:$0xff] %v297_v31  }
  0x9b   :  { %319 = vst [vmem:[#allocation2 + $0x30] sm:$0xff] %v307_v32  }
  0x9d   :  { %v151_v33 = vpop.f32.mrf.mxu2  ;;  %v161_v34 = vpop.f32.mrf.mxu3 }
  0x9e   :  { %v133_v35 = vpop.f32.mrf.mxu0  ;;  %v143_v36 = vpop.f32.mrf.mxu1  ;;  %v152_v45 = vadd.f32 %v330_v12, %v151_v33  ;;  %v162_v46 = vadd.f32 %v330_v12, %v161_v34 }
  0x9f   :  { %v134_v39 = vadd.f32 %v330_v12, %v133_v35  ;;  %v144_v40 = vadd.f32 %v330_v12, %v143_v36 }
  0xa1   :  { %v282_v41 = vpack.c.bf16 %v134_v39, %v132_v37  ;;  %v292_v42 = vpack.c.bf16 %v144_v40, %v142_v38 }
  0xa3   :  { %314 = vst [vmem:[#allocation2 + $0x8] sm:$0xff] %v282_v41  }
  0xa4   :  { %316 = vst [vmem:[#allocation2 + $0x18] sm:$0xff] %v292_v42  }
  0xa5   :  { %v153_v43 = vpop.f32.mrf.mxu2  ;;  %v163_v44 = vpop.f32.mrf.mxu3 }
  0xa6   :  { %v154_v47 = vadd.f32 %v330_v12, %v153_v43  ;;  %v164_v48 = vadd.f32 %v330_v12, %v163_v44 }
  0xa8   :  { %v302_v49 = vpack.c.bf16 %v154_v47, %v152_v45  ;;  %v312_v50 = vpack.c.bf16 %v164_v48, %v162_v46 }
  0xaa   :  { %318 = vst [vmem:[#allocation2 + $0x28] sm:$0xff] %v302_v49  }
  0xab   :  { %320 = vst [vmem:[#allocation2 + $0x38] sm:$0xff] %v312_v50  }
  0xac   :  { %210 = dma.vmem_to_hbm [thread:$0]  %s203_s2, 1024, %s205_s8, [#allocation3], %s358_s9, %s358_s9, %s359_s10  }
  0xad   :  { %355 = dma.done.wait [#allocation3], 1024  }
  0xae   :  { %356 = vsyncadd [#allocation3], 4294966272 }
  0xaf   :  { %215 = vsyncpa [#allocation3], 1 }

</bundles_post_ra>
